<compile_context>
chip_gen: v7x
topology: tpu7x:2x2x1
jax: 0.10.0
libtpu: 0.0.40
codegen_flags: <defaults>
</compile_context>

<pallas_src>
import functools

import jax
import jax.numpy as jnp
from jax.experimental import pallas as pl
from jax.experimental.pallas import tpu as pltpu

_EPS = 1e-10
_LANES = 128
_MAX_BLOCK_ROWS = 2048  # (2048, 128) f32 = 1 MiB per input buffer


def _make_kernel(total_rows: int, block_rows: int):
    """Builds the CE reduction kernel, specialized on static sizes."""
    needs_mask = (total_rows % block_rows) != 0

    def kernel(p_ref, m_ref, num_ref, den_ref, acc_num_ref, acc_den_ref):
        i = pl.program_id(0)

        @pl.when(i == 0)
        def _():
            acc_num_ref[...] = jnp.zeros_like(acc_num_ref)
            acc_den_ref[...] = jnp.zeros_like(acc_den_ref)

        p = p_ref[...].astype(jnp.float32)
        m = m_ref[...].astype(jnp.float32)

        if needs_mask:
            # Only the ragged last block has rows past the array end; neutral
            # values (p=1 -> log=0, m=0) keep both sums unchanged.
            row_ids = i * block_rows + jax.lax.broadcasted_iota(
                jnp.int32, (block_rows, _LANES), 0
            )
            valid = row_ids < total_rows
            p = jnp.where(valid, p, 1.0)
            m = jnp.where(valid, m, 0.0)

        # Pure VPU/EUP work per step; no cross-lane reduce, no (1,1) store.
        acc_num_ref[...] += m * jnp.log(p + _EPS)
        acc_den_ref[...] += m

        @pl.when(i == pl.num_programs(0) - 1)
        def _():
            num_ref[...] = jnp.sum(acc_num_ref[...], keepdims=True)
            den_ref[...] = jnp.sum(acc_den_ref[...], keepdims=True)

    return kernel


def _reduce_sums(p2: jax.Array, m2: jax.Array, block_rows: int):
    rows = p2.shape[0]
    grid = (pl.cdiv(rows, block_rows),)
    n_elems = rows * _LANES

    kernel = _make_kernel(total_rows=rows, block_rows=block_rows)

    num, den = pl.pallas_call(
        kernel,
        out_shape=(
            jax.ShapeDtypeStruct((1, 1), jnp.float32),
            jax.ShapeDtypeStruct((1, 1), jnp.float32),
        ),
        grid_spec=pltpu.PrefetchScalarGridSpec(
            num_scalar_prefetch=0,
            grid=grid,
            in_specs=[
                pl.BlockSpec((block_rows, _LANES), lambda i: (i, 0)),
                pl.BlockSpec((block_rows, _LANES), lambda i: (i, 0)),
            ],
            out_specs=[
                pl.BlockSpec((1, 1), lambda i: (0, 0)),
                pl.BlockSpec((1, 1), lambda i: (0, 0)),
            ],
            scratch_shapes=[
                pltpu.VMEM((block_rows, _LANES), jnp.float32),
                pltpu.VMEM((block_rows, _LANES), jnp.float32),
            ],
        ),
        compiler_params=pltpu.CompilerParams(
            dimension_semantics=("arbitrary",),
            vmem_limit_bytes=32 * 1024 * 1024,
        ),
        cost_estimate=pl.CostEstimate(
            flops=3 * n_elems,
            transcendentals=n_elems,
            bytes_accessed=(
                p2.size * p2.dtype.itemsize + m2.size * m2.dtype.itemsize + 8
            ),
        ),
    )(p2, m2)
    return num[0, 0], den[0, 0]


@functools.partial(jax.jit, static_argnames=("idc",))
def cross_entropy(probs: jax.Array, target: jax.Array, idc: tuple[int, ...]):
    """Pallas equivalent of CrossEntropy.forward.

    probs, target: (B, C, H, W), simplex along axis=1.  Returns f32 scalar loss:
        -sum(target[:, idc] * log(probs[:, idc] + 1e-10)) / (sum(target[:, idc]) + 1e-10)
    """
    # TODO(synk): the host-side `assert simplex(...)` input check is omitted.
    idx = jnp.asarray(idc, dtype=jnp.int32)
    # Keep HBM dtypes narrow; the f32 upcast happens inside the kernel.
    p_sel = jnp.take(probs, idx, axis=1)   # (B, K, H, W)
    m_sel = jnp.take(target, idx, axis=1)  # (B, K, H, W)

    n = p_sel.size
    # Pad only up to one (8, 128) tile (<= 1023 elements, fuses with the take);
    # full ragged blocks are masked inside the kernel instead of padded here.
    tile_elems = 8 * _LANES
    pad = (-n) % tile_elems
    p_flat = p_sel.reshape(-1)
    m_flat = m_sel.reshape(-1)
    if pad:
        p_flat = jnp.pad(p_flat, (0, pad), constant_values=1)  # log(1) = 0
        m_flat = jnp.pad(m_flat, (0, pad), constant_values=0)  # no contribution

    rows = (n + pad) // _LANES  # multiple of 8
    p2 = p_flat.reshape(rows, _LANES)
    m2 = m_flat.reshape(rows, _LANES)

    block_rows = min(_MAX_BLOCK_ROWS, rows)  # static; multiple of 8
    num, den = _reduce_sums(p2, m2, block_rows)
    return -num / (den + _EPS)


def _reference(probs, target, idc):
    idx = jnp.asarray(idc, dtype=jnp.int32)
    log_p = jnp.log(jnp.take(probs, idx, axis=1).astype(jnp.float32) + _EPS)
    mask = jnp.take(target, idx, axis=1).astype(jnp.float32)
    loss = -jnp.sum(mask * log_p)
    return loss / (jnp.sum(mask) + _EPS)


if __name__ == "__main__":
    B, C, H, W = 2, 4, 16, 16
    idc = (1, 2, 3)

    key = jax.random.PRNGKey(0)
    k_logits, k_labels = jax.random.split(key)

    # probs: softmax over channel axis -> simplex along axis=1.
    logits = jax.random.normal(k_logits, (B, C, H, W), dtype=jnp.float32)
    probs = jax.nn.softmax(logits, axis=1)

    # target: one-hot over channels -> simplex along axis=1.
    labels = jax.random.randint(k_labels, (B, H, W), 0, C)
    target = jax.nn.one_hot(labels, C, axis=1, dtype=jnp.float32)  # (B, C, H, W)

    loss = cross_entropy(probs, target, idc)
    loss = jax.block_until_ready(loss)

    ref = _reference(probs, target, idc)
    assert jnp.allclose(loss, ref, rtol=1e-5, atol=1e-6), (loss, ref)

    print("KERNEL_OK")
</pallas_src>

<mosaic_0001>
module attributes {stable_mosaic.version = 11 : i64} {
  func.func @kernel(%arg0: i32, %arg1: memref<16x128xf32, #tpu.memory_space<vmem>>, %arg2: memref<16x128xf32, #tpu.memory_space<vmem>>, %arg3: memref<1x1xf32, #tpu.memory_space<vmem>>, %arg4: memref<1x1xf32, #tpu.memory_space<vmem>>, %arg5: memref<16x128xf32, #tpu.memory_space<vmem>>, %arg6: memref<16x128xf32, #tpu.memory_space<vmem>>) attributes {dimension_semantics = [#tpu.dimension_semantics<arbitrary>], iteration_bounds = array<i64: 1>, scalar_prefetch = 0 : i64, scratch_operands = 2 : i64, tpu.core_type = #tpu.core_type<tc>, window_params = [{transform_indices = @transform_0, window_bounds = array<i64: 16, 128>}, {transform_indices = @transform_1, window_bounds = array<i64: 16, 128>}, {pipeline_mode = #tpu.pipeline_mode<synchronous>, transform_indices = @transform_2, window_bounds = array<i64: 1, 1>}, {pipeline_mode = #tpu.pipeline_mode<synchronous>, transform_indices = @transform_3, window_bounds = array<i64: 1, 1>}]} {
    %c0_i32 = arith.constant 0 : i32
    %0 = arith.cmpi eq, %arg0, %c0_i32 : i32
    %1 = arith.extui %0 : i1 to i32
    %c0_i32_0 = arith.constant 0 : i32
    %2 = arith.cmpi ne, %1, %c0_i32_0 : i32
    scf.if %2 {
      %cst_14 = arith.constant 0.000000e+00 : f32
      %18 = vector.broadcast %cst_14 : f32 to vector<16x128xf32>
      %c0_15 = arith.constant 0 : index
      %c0_16 = arith.constant 0 : index
      %19 = vector.load %arg5[%c0_15, %c0_16] : memref<16x128xf32, #tpu.memory_space<vmem>>, vector<16x128xf32>
      tpu.vector_store %arg5[%c0_15, %c0_16], %18 {strides = array<i32>} : memref<16x128xf32, #tpu.memory_space<vmem>>, vector<16x128xf32>,
      %cst_17 = arith.constant 0.000000e+00 : f32
      %20 = vector.broadcast %cst_17 : f32 to vector<16x128xf32>
      %c0_18 = arith.constant 0 : index
      %c0_19 = arith.constant 0 : index
      %21 = vector.load %arg6[%c0_18, %c0_19] : memref<16x128xf32, #tpu.memory_space<vmem>>, vector<16x128xf32>
      tpu.vector_store %arg6[%c0_18, %c0_19], %20 {strides = array<i32>} : memref<16x128xf32, #tpu.memory_space<vmem>>, vector<16x128xf32>,
    } else {
    }
    %c0 = arith.constant 0 : index
    %c0_1 = arith.constant 0 : index
    %3 = vector.load %arg1[%c0, %c0_1] : memref<16x128xf32, #tpu.memory_space<vmem>>, vector<16x128xf32>
    %c0_2 = arith.constant 0 : index
    %c0_3 = arith.constant 0 : index
    %4 = vector.load %arg2[%c0_2, %c0_3] : memref<16x128xf32, #tpu.memory_space<vmem>>, vector<16x128xf32>
    %c0_4 = arith.constant 0 : index
    %c0_5 = arith.constant 0 : index
    %5 = vector.load %arg5[%c0_4, %c0_5] : memref<16x128xf32, #tpu.memory_space<vmem>>, vector<16x128xf32>
    %cst = arith.constant 1.000000e-10 : f32
    %6 = vector.broadcast %cst : f32 to vector<16x128xf32>
    %7 = arith.addf %3, %6 : vector<16x128xf32>
    %8 = math.log %7 : vector<16x128xf32>
    %9 = arith.mulf %4, %8 : vector<16x128xf32>
    %10 = arith.addf %5, %9 : vector<16x128xf32>
    %c0_6 = arith.constant 0 : index
    %c0_7 = arith.constant 0 : index
    %11 = vector.load %arg5[%c0_6, %c0_7] : memref<16x128xf32, #tpu.memory_space<vmem>>, vector<16x128xf32>
    tpu.vector_store %arg5[%c0_6, %c0_7], %10 {strides = array<i32>} : memref<16x128xf32, #tpu.memory_space<vmem>>, vector<16x128xf32>,
    %c0_8 = arith.constant 0 : index
    %c0_9 = arith.constant 0 : index
    %12 = vector.load %arg6[%c0_8, %c0_9] : memref<16x128xf32, #tpu.memory_space<vmem>>, vector<16x128xf32>
    %13 = arith.addf %12, %4 : vector<16x128xf32>
    %c0_10 = arith.constant 0 : index
    %c0_11 = arith.constant 0 : index
    %14 = vector.load %arg6[%c0_10, %c0_11] : memref<16x128xf32, #tpu.memory_space<vmem>>, vector<16x128xf32>
    tpu.vector_store %arg6[%c0_10, %c0_11], %13 {strides = array<i32>} : memref<16x128xf32, #tpu.memory_space<vmem>>, vector<16x128xf32>,
    %c0_i32_12 = arith.constant 0 : i32
    %15 = arith.cmpi eq, %arg0, %c0_i32_12 : i32
    %16 = arith.extui %15 : i1 to i32
    %c0_i32_13 = arith.constant 0 : i32
    %17 = arith.cmpi ne, %16, %c0_i32_13 : i32
    scf.if %17 {
      %c0_14 = arith.constant 0 : index
      %c0_15 = arith.constant 0 : index
      %18 = vector.load %arg5[%c0_14, %c0_15] : memref<16x128xf32, #tpu.memory_space<vmem>>, vector<16x128xf32>
      %19 = vector.shape_cast %18 : vector<16x128xf32> to vector<1x16x128xf32>
      %cst_16 = arith.constant dense<0.000000e+00> : vector<1xf32>
      %20 = vector.multi_reduction <add>, %19, %cst_16 [1, 2] : vector<1x16x128xf32> to vector<1xf32>
      %21 = vector.shape_cast %20 : vector<1xf32> to vector<1x1x1xf32>
      %22 = vector.extract %21[0, 0, 0] : f32 from vector<1x1x1xf32>
      %23 = vector.broadcast %22 : f32 to vector<1x1xf32>
      %c0_17 = arith.constant 0 : index
      %c0_18 = arith.constant 0 : index
      %24 = vector.load %arg3[%c0_17, %c0_18] : memref<1x1xf32, #tpu.memory_space<vmem>>, vector<1x1xf32>
      tpu.vector_store %arg3[%c0_17, %c0_18], %23 {strides = array<i32>} : memref<1x1xf32, #tpu.memory_space<vmem>>, vector<1x1xf32>,
      %c0_19 = arith.constant 0 : index
      %c0_20 = arith.constant 0 : index
      %25 = vector.load %arg6[%c0_19, %c0_20] : memref<16x128xf32, #tpu.memory_space<vmem>>, vector<16x128xf32>
      %26 = vector.shape_cast %25 : vector<16x128xf32> to vector<1x16x128xf32>
      %cst_21 = arith.constant dense<0.000000e+00> : vector<1xf32>
      %27 = vector.multi_reduction <add>, %26, %cst_21 [1, 2] : vector<1x16x128xf32> to vector<1xf32>
      %28 = vector.shape_cast %27 : vector<1xf32> to vector<1x1x1xf32>
      %29 = vector.extract %28[0, 0, 0] : f32 from vector<1x1x1xf32>
      %30 = vector.broadcast %29 : f32 to vector<1x1xf32>
      %c0_22 = arith.constant 0 : index
      %c0_23 = arith.constant 0 : index
      %31 = vector.load %arg4[%c0_22, %c0_23] : memref<1x1xf32, #tpu.memory_space<vmem>>, vector<1x1xf32>
      tpu.vector_store %arg4[%c0_22, %c0_23], %30 {strides = array<i32>} : memref<1x1xf32, #tpu.memory_space<vmem>>, vector<1x1xf32>,
    } else {
    }
    return
  }
  func.func @transform_0(%arg0: i32) -> (i32, i32) {
    %c0_i32 = arith.constant 0 : i32
    %c0_i32_0 = arith.constant 0 : i32
    return %arg0, %c0_i32 : i32, i32
  }
  func.func @transform_1(%arg0: i32) -> (i32, i32) {
    %c0_i32 = arith.constant 0 : i32
    %c0_i32_0 = arith.constant 0 : i32
    return %arg0, %c0_i32 : i32, i32
  }
  func.func @transform_2(%arg0: i32) -> (i32, i32) {
    %c0_i32 = arith.constant 0 : i32
    %c0_i32_0 = arith.constant 0 : i32
    %c0_i32_1 = arith.constant 0 : i32
    return %c0_i32, %c0_i32_0 : i32, i32
  }
  func.func @transform_3(%arg0: i32) -> (i32, i32) {
    %c0_i32 = arith.constant 0 : i32
    %c0_i32_0 = arith.constant 0 : i32
    %c0_i32_1 = arith.constant 0 : i32
    return %c0_i32, %c0_i32_0 : i32, i32
  }
}

</mosaic_0001>

<bundles_post_ra>
// kernel: cross_entropy.1
= control target key start
LH: loop header
LB: loop body
LE: loop exit
PB: predicated region body
PF: predicated region fallthrough
CT: control target
= control target key end

     0   :  { %9 = vsyncpa [#allocation5], 0  ;;  %s225_s0 = inlined_call_operand.vmem [shape: f32[16,128], index: 0, kind: input, shape index: {}]   ;;  %s226_s1 = inlined_call_operand.vmem [shape: f32[16,128], index: 1, kind: input, shape index: {}]   ;;  %s227_s2 = inlined_call_operand.hbm [shape: f32[1,1], index: 2, kind: output, shape index: {0}]   ;;  %s228_s3 = inlined_call_operand.hbm [shape: f32[1,1], index: 3, kind: output, shape index: {1}]  }
   0x1   :  { %v23_v0 = vld [vmem:[%s225_s0] sm:$0xff]  ;;  %v24_v1 = vld [vmem:[%s225_s0 + $0x8] sm:$0xff] }
   0x2   :  { %v29_v2 = vadd.f32 1e-10, %v23_v0  ;;  %v30_v3 = vadd.f32 1e-10, %v24_v1 }
   0x3   :  { %10 = vsyncpa [#allocation7], 0  ;;  %v25_v5 = vld [vmem:[%s226_s1] sm:$0xff]  ;;  %v26_v7 = vld [vmem:[%s226_s1 + $0x8] sm:$0xff]  ;;  %s165_s0 = smov [#allocation4]   ;;  %vm63_vm0 = vcmask 0  }
   0x4   :  { %113 = vlog2.f32 %v29_v2  ;;  %v67_v13 = vadd.f32 %v26_v7, %v25_v5  ;;  %s85_s1 = sshll.u32 %s165_s0, 4  ;;  %s166_s21 = smov [#allocation6]   ;;  %s86_s1 = int_to_ptr.vmem [resolvable:$true] %s85_s1 }
   0x5   :  { %115 = vlog2.f32 %v30_v3  ;;  %s95_s22 = sshll.u32 %s166_s21, 4  ;;  %s117_s23 = scalar_lea.vmem %s86_s1, 16  ;;  %s96_s22 = int_to_ptr.vmem [resolvable:$true] %s95_s22 }
   0x6   :  { %p118_p0 = scmp.ne.s32.totalorder %s86_s1, %s117_s23  ;;  %s121_s24 = scalar_lea.vmem %s86_s1, 32 }
   0x7   :  { %p122_p1 = scmp.lt.s32.totalorder %s86_s1, %s86_s1  ;;  %p123_p2 = scmp.lt.s32.totalorder %s121_s24, %s117_s23 }
   0x9   :  { %p124_p3 = por %p123_p2, %p122_p1 }
   0xb   :  { %p125_p4 = pnand %p124_p3, %p118_p0 }
   0xe   :  { %v114_v4 = vpop.eup %113 }
   0xf   :  { %v116_v6 = vpop.eup %115  ;;  %v32_v8 = vmul.f32 0.6931472, %v114_v4 }
  0x10   :  { %v34_v9 = vmul.f32 0.6931472, %v116_v6 }
  0x11   :  { %v35_v10 = vmul.f32 %v32_v8, %v25_v5 }
  0x12   :  { %v36_v11 = vmul.f32 %v34_v9, %v26_v7 }
  0x14   :  { %v52_v12 = vadd.f32 %v36_v11, %v35_v10 }
  0x16   :  { %53 = vadd.xlane.f32.xlu0 %v52_v12 }
  0x1a   :  { %68 = vadd.xlane.f32.xlu0 %v67_v13 }
  0xa3   :  { %v54_v14 = vpop.xlane.xlu0 %53 }
  0xa4   :  { %v55_v15 = vrot.slane %v54_v14, 4 }
  0xa6   :  { %v56_v16 = vadd.f32 %v55_v15, %v54_v14 }
  0xa7   :  { %v69_v17 = vpop.xlane.xlu0 %68 }
  0xa8   :  { %v57_v18 = vrot.slane %v56_v16, 2  ;;  %v70_v19 = vrot.slane %v69_v17, 4 }
  0xaa   :  { %v71_v20 = vadd.f32 %v70_v19, %v69_v17  ;;  %v58_v21 = vadd.f32 %v57_v18, %v56_v16 }
  0xac   :  { %v72_v22 = vrot.slane %v71_v20, 2  ;;  %v59_v23 = vrot.slane %v58_v21, 1 }
  0xae   :  { %v73_v24 = vadd.f32 %v72_v22, %v71_v20  ;;  %v60_v25 = vadd.f32 %v59_v23, %v58_v21 }
  0xb0   :  { %107 = vpush %v60_v25  ;;  %v74_v26 = vrot.slane %v73_v24, 1 }
  0xb2   :  { %v75_v27 = vadd.f32 %v74_v26, %v73_v24 }
  0xb4   :  { %109 = vpush %v75_v27 }
  0xe1   :  { %s108_s20 = spop %107 }
  0xe2   :  { %v62_v28 = vstv %s108_s20 }
  0xe3   :  { %64 = vst.msk [vmem:[#allocation4] sm:$0x1] %vm63_vm0, %v62_v28 }
  0xe4   :  { %128 = shalt.err (!%p125_p4)
}
  0xe5   :  { %s129_s27 = scalar_lea.hbm %s227_s2, 16 }
  0xe6   :  { %p130_p5 = scmp.ne.s32.totalorder %s227_s2, %s129_s27  ;;  %p133_p6 = scmp.lt.u32.totalorder %s129_s27, %s227_s2 }
  0xe8   :  { %p135_p7 = pnand %p133_p6, %p130_p5 }
  0xea   :  { %138 = shalt.err (!%p135_p7)
}
  0xeb   :  { %88 = dma.vmem_to_hbm [thread:$0]  %s86_s1, 16, %s227_s2, [#allocation5]  }
  0xec   :  { %s110_s7 = spop %109  ;;  %s139_s8 = scalar_lea.vmem %s96_s22, 16 }
  0xed   :  { %v77_v29 = vstv %s110_s7  ;;  %p140_p8 = scmp.ne.s32.totalorder %s96_s22, %s139_s8  ;;  %s143_s9 = scalar_lea.vmem %s96_s22, 32 }
  0xee   :  { %78 = vst.msk [vmem:[#allocation6] sm:$0x1] %vm63_vm0, %v77_v29  ;;  %p144_p9 = scmp.lt.s32.totalorder %s96_s22, %s96_s22  ;;  %p145_p10 = scmp.lt.s32.totalorder %s143_s9, %s139_s8 }
  0xf0   :  { %p146_p11 = por %p145_p10, %p144_p9 }
  0xf2   :  { %p147_p12 = pnand %p146_p11, %p140_p8 }
  0xf4   :  { %150 = shalt.err (!%p147_p12)
}
  0xf5   :  { %s151_s12 = scalar_lea.hbm %s228_s3, 16 }
  0xf6   :  { %p152_p13 = scmp.ne.s32.totalorder %s228_s3, %s151_s12  ;;  %p155_p0 = scmp.lt.u32.totalorder %s151_s12, %s228_s3 }
  0xf8   :  { %p157_p1 = pnand %p155_p0, %p152_p13 }
  0xfa   :  { %160 = shalt.err (!%p157_p1)
}
  0xfb   :  { %98 = dma.vmem_to_hbm [thread:$0]  %s96_s22, 16, %s228_s3, [#allocation7]  }
  0xfc   :  { %161 = dma.done.wait [#allocation5], 16  }
  0xfd   :  { %162 = vsyncadd [#allocation5], 4294967280 }
  0xfe   :  { %163 = dma.done.wait [#allocation7], 16  }
  0xff   :  { %164 = vsyncadd [#allocation7], 4294967280 }
 0x100   :  { %105 = vsyncpa [#allocation5], 1 }
 0x101   :  { %106 = vsyncpa [#allocation7], 1 }

</bundles_post_ra>
